<compile_context>
chip_gen: v5e
topology: v5e:2x2
jax: 0.10.0
libtpu: 0.0.40
codegen_flags: <defaults>
</compile_context>

<pallas_src>
import jax
import jax.numpy as jnp
from jax.experimental import pallas as pl
from jax.experimental.pallas import tpu as pltpu


LANE = 128         # TPU lane width (last-dim tiling)
SUBLANE = 8        # sublane tiling for the second-to-last dim
TILE_B_MAX = 4096  # batch rows per grid step (<< v7x 64 MiB VMEM)
VMEM_LIMIT_BYTES = 48 * 1024 * 1024


def _round_up(n, m):
    return ((n + m - 1) // m) * m


# ----------------------------------------------------------------------------
# Pallas kernel: fused 4-layer MLP (3x ReLU), one batch tile per grid step.
# All weights/biases are VMEM-resident (constant index_map); activations
# stream (tile_b, D) blocks. Intermediates never touch HBM.
# ----------------------------------------------------------------------------
def _mlp_kernel(x_ref,
                w1_ref, b1_ref,
                w2_ref, b2_ref,
                w3_ref, b3_ref,
                w4_ref, b4_ref,
                o_ref):
    # fused input cast: f32 streamed in, bf16 operand for the MXU
    x = x_ref[...].astype(jnp.bfloat16)

    h = jnp.dot(x, w1_ref[...], preferred_element_type=jnp.float32) + b1_ref[...]
    h = jnp.maximum(h, 0.0).astype(jnp.bfloat16)

    h = jnp.dot(h, w2_ref[...], preferred_element_type=jnp.float32) + b2_ref[...]
    h = jnp.maximum(h, 0.0).astype(jnp.bfloat16)

    h = jnp.dot(h, w3_ref[...], preferred_element_type=jnp.float32) + b3_ref[...]
    h = jnp.maximum(h, 0.0).astype(jnp.bfloat16)

    # final layer: true D_out width (no padded writeback), f32 store
    o_ref[...] = (jnp.dot(h, w4_ref[...], preferred_element_type=jnp.float32)
                  + b4_ref[...]).astype(o_ref.dtype)


def mlp_forward(x2d, params, d_out):
    """x2d: [B, D_in] f32; params: 4x (W_t [in_pad, out_pad] bf16, b [1, out_pad] f32)."""
    (w1, b1), (w2, b2), (w3, b3), (w4, b4) = params
    B, d_in = x2d.shape
    h_pad = w1.shape[1]

    x2d = x2d.astype(jnp.float32)

    # Batch tiling. Partial last block is handled by Pallas (masked stores),
    # so no batch padding pass is needed.
    tile_b = min(TILE_B_MAX, _round_up(max(B, 1), SUBLANE))
    # v7x: make sure the batch grid has >=2 steps so both TensorCores work.
    if B > SUBLANE and pl.cdiv(B, tile_b) < 2:
        tile_b = _round_up(pl.cdiv(B, 2), SUBLANE)
    grid = (pl.cdiv(B, tile_b),)

    # VMEM residency guard: resident weights + double-buffered stream tiles.
    resident = sum(int(a.size) * a.dtype.itemsize for p in params for a in p)
    streamed = 2 * (tile_b * d_in * 4 + tile_b * d_out * 4)
    # TODO(synk): for very large H (>~2.5k) stream W2/W3/W4 over a K grid axis
    #             instead of keeping them VMEM-resident.
    assert resident + streamed < 40 * 1024 * 1024, (
        "weights too large for VMEM-resident design; needs a streamed-K variant")

    def const_map(i):  # weights/biases: same block every step (resident)
        return (0, 0)

    in_specs = [
        pl.BlockSpec((tile_b, d_in), lambda i: (i, 0)),   # streamed activations
        pl.BlockSpec(w1.shape, const_map), pl.BlockSpec(b1.shape, const_map),
        pl.BlockSpec(w2.shape, const_map), pl.BlockSpec(b2.shape, const_map),
        pl.BlockSpec(w3.shape, const_map), pl.BlockSpec(b3.shape, const_map),
        pl.BlockSpec(w4.shape, const_map), pl.BlockSpec(b4.shape, const_map),
    ]
    out_specs = pl.BlockSpec((tile_b, d_out), lambda i: (i, 0))

    flops = 2 * B * (d_in * h_pad + 2 * h_pad * h_pad + h_pad * d_out)
    bytes_accessed = (B * d_in * 4            # x read (f32)
                      + B * d_out * 4         # out write (f32)
                      + resident)             # weights
    cost = pl.CostEstimate(flops=int(flops), transcendentals=0,
                           bytes_accessed=int(bytes_accessed))

    return pl.pallas_call(
        _mlp_kernel,
        out_shape=jax.ShapeDtypeStruct((B, d_out), jnp.float32),
        grid=grid,
        in_specs=in_specs,
        out_specs=out_specs,
        compiler_params=pltpu.CompilerParams(
            dimension_semantics=("parallel",),
            vmem_limit_bytes=VMEM_LIMIT_BYTES),
        cost_estimate=cost,
    )(x2d, w1, b1, w2, b2, w3, b3, w4, b4)


# ----------------------------------------------------------------------------
# Spectral normalization (parameter setup / glue, plain JAX).
# Mirrors torch.nn.utils.spectral_norm with n_power_iterations=1, eps=1e-12:
#   v = normalize(W^T u); u = normalize(W v); sigma = u^T W v; W_sn = W / sigma
# ----------------------------------------------------------------------------
def _l2_normalize(v, eps=1e-12):
    return v / jnp.maximum(jnp.linalg.norm(v), eps)


def spectral_normalize(w, u0):
    # w: [out, in] (PyTorch layout), u0: [out]
    u = _l2_normalize(u0)
    v = _l2_normalize(w.T @ u)
    u = _l2_normalize(w @ v)
    sigma = u @ (w @ v)
    return w / sigma


# ----------------------------------------------------------------------------
# Net: deterministic parameter init + forward via the Pallas kernel.
# Hidden dims are zero-padded to 128 lanes at init time (free at runtime).
# ----------------------------------------------------------------------------
class Net:
    def __init__(self, D_in, H, D_out, key):
        self.D_in, self.H, self.D_out = D_in, H, D_out
        h_pad = _round_up(H, LANE)
        dims = [(D_in, H), (H, H), (H, H), (H, D_out)]
        n_layers = len(dims)
        self.params = []
        for li, (fan_in, fan_out) in enumerate(dims):
            key, kw, kb, ku = jax.random.split(key, 4)
            bound = 1.0 / (fan_in ** 0.5)
            w = jax.random.uniform(kw, (fan_out, fan_in), jnp.float32,
                                   -bound, bound)            # PyTorch [out, in]
            b = jax.random.uniform(kb, (fan_out,), jnp.float32, -bound, bound)
            u0 = jax.random.normal(ku, (fan_out,), jnp.float32)
            w_sn = spectral_normalize(w, u0)

            w_t = w_sn.T                       # [in, out] for y = x @ W
            b_row = b.reshape(1, fan_out)

            # Lane-pad hidden dims to 128 (first-layer input stays D_in,
            # last-layer output stays D_out). Pad entries are exactly zero so
            # bias(=0)+ReLU keep padded columns at 0.
            in_pad = fan_in if li == 0 else h_pad
            out_pad = fan_out if li == n_layers - 1 else h_pad
            w_t = jnp.pad(w_t, ((0, in_pad - fan_in), (0, out_pad - fan_out)))
            b_row = jnp.pad(b_row, ((0, 0), (0, out_pad - fan_out)))

            self.params.append((w_t.astype(jnp.bfloat16),     # bf16 MXU weights
                                b_row.astype(jnp.float32)))   # f32 bias epilogue

    def __call__(self, x):
        x2d = jnp.reshape(x, (-1, self.D_in))
        return mlp_forward(x2d, self.params, self.D_out)


if __name__ == "__main__":
    key = jax.random.PRNGKey(0)
    k_params, k_x = jax.random.split(key)

    D_in, H, D_out = 32, 32, 8
    net = Net(D_in, H, D_out, k_params)

    # input flattens via view(-1, D_in):  (2, 4, 32) -> (8, 32)
    x = jax.random.normal(k_x, (2, 4, D_in), jnp.float32)

    out = net(x)
    out = jax.block_until_ready(out)
    assert out.shape == (8, D_out)
    assert jnp.all(jnp.isfinite(out))
    print("KERNEL_OK")
</pallas_src>

<mosaic_0001>
module attributes {stable_mosaic.version = 11 : i64} {
  func.func @_mlp_kernel(%arg0: i32, %arg1: memref<8x32xf32, #tpu.memory_space<vmem>>, %arg2: memref<32x128xbf16, #tpu.memory_space<vmem>>, %arg3: memref<1x128xf32, #tpu.memory_space<vmem>>, %arg4: memref<128x128xbf16, #tpu.memory_space<vmem>>, %arg5: memref<1x128xf32, #tpu.memory_space<vmem>>, %arg6: memref<128x128xbf16, #tpu.memory_space<vmem>>, %arg7: memref<1x128xf32, #tpu.memory_space<vmem>>, %arg8: memref<128x8xbf16, #tpu.memory_space<vmem>>, %arg9: memref<1x8xf32, #tpu.memory_space<vmem>>, %arg10: memref<8x8xf32, #tpu.memory_space<vmem>>) attributes {dimension_semantics = [#tpu.dimension_semantics<parallel>], iteration_bounds = array<i64: 1>, scalar_prefetch = 0 : i64, scratch_operands = 0 : i64, tpu.core_type = #tpu.core_type<tc>, window_params = [{transform_indices = @transform_0, window_bounds = array<i64: 8, 32>}, {pipeline_mode = #tpu.pipeline_mode<synchronous>, transform_indices = @transform_1, window_bounds = array<i64: 32, 128>}, {pipeline_mode = #tpu.pipeline_mode<synchronous>, transform_indices = @transform_2, window_bounds = array<i64: 1, 128>}, {pipeline_mode = #tpu.pipeline_mode<synchronous>, transform_indices = @transform_3, window_bounds = array<i64: 128, 128>}, {pipeline_mode = #tpu.pipeline_mode<synchronous>, transform_indices = @transform_4, window_bounds = array<i64: 1, 128>}, {pipeline_mode = #tpu.pipeline_mode<synchronous>, transform_indices = @transform_5, window_bounds = array<i64: 128, 128>}, {pipeline_mode = #tpu.pipeline_mode<synchronous>, transform_indices = @transform_6, window_bounds = array<i64: 1, 128>}, {pipeline_mode = #tpu.pipeline_mode<synchronous>, transform_indices = @transform_7, window_bounds = array<i64: 128, 8>}, {pipeline_mode = #tpu.pipeline_mode<synchronous>, transform_indices = @transform_8, window_bounds = array<i64: 1, 8>}, {transform_indices = @transform_9, window_bounds = array<i64: 8, 8>}]} {
    %c0 = arith.constant 0 : index
    %c0_0 = arith.constant 0 : index
    %0 = vector.load %arg1[%c0, %c0_0] : memref<8x32xf32, #tpu.memory_space<vmem>>, vector<8x32xf32>
    %1 = arith.truncf %0 : vector<8x32xf32> to vector<8x32xbf16>
    %c0_1 = arith.constant 0 : index
    %c0_2 = arith.constant 0 : index
    %2 = vector.load %arg2[%c0_1, %c0_2] : memref<32x128xbf16, #tpu.memory_space<vmem>>, vector<32x128xbf16>
    %cst = arith.constant dense<0.000000e+00> : vector<8x128xf32>
    %3 = tpu.matmul %1, %2, %cst {dimension_numbers = #tpu.dot_dimension_numbers<[1], [0], [0], [1], [0, 0, 1, 1], [], []>} : vector<8x32xbf16>, vector<32x128xbf16>, vector<8x128xf32> -> vector<8x128xf32>
    %c0_3 = arith.constant 0 : index
    %c0_4 = arith.constant 0 : index
    %4 = vector.load %arg3[%c0_3, %c0_4] : memref<1x128xf32, #tpu.memory_space<vmem>>, vector<1x128xf32>
    %5 = vector.broadcast %4 : vector<1x128xf32> to vector<8x128xf32>
    %6 = arith.addf %3, %5 : vector<8x128xf32>
    %cst_5 = arith.constant 0.000000e+00 : f32
    %7 = vector.broadcast %cst_5 : f32 to vector<8x128xf32>
    %8 = arith.maximumf %6, %7 : vector<8x128xf32>
    %9 = arith.truncf %8 : vector<8x128xf32> to vector<8x128xbf16>
    %c0_6 = arith.constant 0 : index
    %c0_7 = arith.constant 0 : index
    %10 = vector.load %arg4[%c0_6, %c0_7] : memref<128x128xbf16, #tpu.memory_space<vmem>>, vector<128x128xbf16>
    %cst_8 = arith.constant dense<0.000000e+00> : vector<8x128xf32>
    %11 = tpu.matmul %9, %10, %cst_8 {dimension_numbers = #tpu.dot_dimension_numbers<[1], [0], [0], [1], [0, 0, 1, 1], [], []>} : vector<8x128xbf16>, vector<128x128xbf16>, vector<8x128xf32> -> vector<8x128xf32>
    %c0_9 = arith.constant 0 : index
    %c0_10 = arith.constant 0 : index
    %12 = vector.load %arg5[%c0_9, %c0_10] : memref<1x128xf32, #tpu.memory_space<vmem>>, vector<1x128xf32>
    %13 = vector.broadcast %12 : vector<1x128xf32> to vector<8x128xf32>
    %14 = arith.addf %11, %13 : vector<8x128xf32>
    %cst_11 = arith.constant 0.000000e+00 : f32
    %15 = vector.broadcast %cst_11 : f32 to vector<8x128xf32>
    %16 = arith.maximumf %14, %15 : vector<8x128xf32>
    %17 = arith.truncf %16 : vector<8x128xf32> to vector<8x128xbf16>
    %c0_12 = arith.constant 0 : index
    %c0_13 = arith.constant 0 : index
    %18 = vector.load %arg6[%c0_12, %c0_13] : memref<128x128xbf16, #tpu.memory_space<vmem>>, vector<128x128xbf16>
    %cst_14 = arith.constant dense<0.000000e+00> : vector<8x128xf32>
    %19 = tpu.matmul %17, %18, %cst_14 {dimension_numbers = #tpu.dot_dimension_numbers<[1], [0], [0], [1], [0, 0, 1, 1], [], []>} : vector<8x128xbf16>, vector<128x128xbf16>, vector<8x128xf32> -> vector<8x128xf32>
    %c0_15 = arith.constant 0 : index
    %c0_16 = arith.constant 0 : index
    %20 = vector.load %arg7[%c0_15, %c0_16] : memref<1x128xf32, #tpu.memory_space<vmem>>, vector<1x128xf32>
    %21 = vector.broadcast %20 : vector<1x128xf32> to vector<8x128xf32>
    %22 = arith.addf %19, %21 : vector<8x128xf32>
    %cst_17 = arith.constant 0.000000e+00 : f32
    %23 = vector.broadcast %cst_17 : f32 to vector<8x128xf32>
    %24 = arith.maximumf %22, %23 : vector<8x128xf32>
    %25 = arith.truncf %24 : vector<8x128xf32> to vector<8x128xbf16>
    %c0_18 = arith.constant 0 : index
    %c0_19 = arith.constant 0 : index
    %26 = vector.load %arg8[%c0_18, %c0_19] : memref<128x8xbf16, #tpu.memory_space<vmem>>, vector<128x8xbf16>
    %cst_20 = arith.constant dense<0.000000e+00> : vector<8x8xf32>
    %27 = tpu.matmul %25, %26, %cst_20 {dimension_numbers = #tpu.dot_dimension_numbers<[1], [0], [0], [1], [0, 0, 1, 1], [], []>} : vector<8x128xbf16>, vector<128x8xbf16>, vector<8x8xf32> -> vector<8x8xf32>
    %c0_21 = arith.constant 0 : index
    %c0_22 = arith.constant 0 : index
    %28 = vector.load %arg9[%c0_21, %c0_22] : memref<1x8xf32, #tpu.memory_space<vmem>>, vector<1x8xf32>
    %29 = vector.broadcast %28 : vector<1x8xf32> to vector<8x8xf32>
    %30 = arith.addf %27, %29 : vector<8x8xf32>
    %c0_23 = arith.constant 0 : index
    %c0_24 = arith.constant 0 : index
    %31 = vector.load %arg10[%c0_23, %c0_24] : memref<8x8xf32, #tpu.memory_space<vmem>>, vector<8x8xf32>
    tpu.vector_store %arg10[%c0_23, %c0_24], %30 {strides = array<i32>} : memref<8x8xf32, #tpu.memory_space<vmem>>, vector<8x8xf32>,
    return
  }
  func.func @transform_0(%arg0: i32) -> (i32, i32) {
    %c0_i32 = arith.constant 0 : i32
    %c0_i32_0 = arith.constant 0 : i32
    return %arg0, %c0_i32 : i32, i32
  }
  func.func @transform_1(%arg0: i32) -> (i32, i32) {
    %c0_i32 = arith.constant 0 : i32
    %c0_i32_0 = arith.constant 0 : i32
    %c0_i32_1 = arith.constant 0 : i32
    return %c0_i32, %c0_i32_0 : i32, i32
  }
  func.func @transform_2(%arg0: i32) -> (i32, i32) {
    %c0_i32 = arith.constant 0 : i32
    %c0_i32_0 = arith.constant 0 : i32
    %c0_i32_1 = arith.constant 0 : i32
    return %c0_i32, %c0_i32_0 : i32, i32
  }
  func.func @transform_3(%arg0: i32) -> (i32, i32) {
    %c0_i32 = arith.constant 0 : i32
    %c0_i32_0 = arith.constant 0 : i32
    %c0_i32_1 = arith.constant 0 : i32
    return %c0_i32, %c0_i32_0 : i32, i32
  }
  func.func @transform_4(%arg0: i32) -> (i32, i32) {
    %c0_i32 = arith.constant 0 : i32
    %c0_i32_0 = arith.constant 0 : i32
    %c0_i32_1 = arith.constant 0 : i32
    return %c0_i32, %c0_i32_0 : i32, i32
  }
  func.func @transform_5(%arg0: i32) -> (i32, i32) {
    %c0_i32 = arith.constant 0 : i32
    %c0_i32_0 = arith.constant 0 : i32
    %c0_i32_1 = arith.constant 0 : i32
    return %c0_i32, %c0_i32_0 : i32, i32
  }
  func.func @transform_6(%arg0: i32) -> (i32, i32) {
    %c0_i32 = arith.constant 0 : i32
    %c0_i32_0 = arith.constant 0 : i32
    %c0_i32_1 = arith.constant 0 : i32
    return %c0_i32, %c0_i32_0 : i32, i32
  }
  func.func @transform_7(%arg0: i32) -> (i32, i32) {
    %c0_i32 = arith.constant 0 : i32
    %c0_i32_0 = arith.constant 0 : i32
    %c0_i32_1 = arith.constant 0 : i32
    return %c0_i32, %c0_i32_0 : i32, i32
  }
  func.func @transform_8(%arg0: i32) -> (i32, i32) {
    %c0_i32 = arith.constant 0 : i32
    %c0_i32_0 = arith.constant 0 : i32
    %c0_i32_1 = arith.constant 0 : i32
    return %c0_i32, %c0_i32_0 : i32, i32
  }
  func.func @transform_9(%arg0: i32) -> (i32, i32) {
    %c0_i32 = arith.constant 0 : i32
    %c0_i32_0 = arith.constant 0 : i32
    return %arg0, %c0_i32 : i32, i32
  }
}

</mosaic_0001>

<bundles_post_ra>
// kernel: tpu_custom_call.1
= control target key start
LH: loop header
LB: loop body
LE: loop exit
PB: predicated region body
PF: predicated region fallthrough
CT: control target
= control target key end

     0   :  { %14 = vsyncpa [#allocation3], 0  ;;  %s758_s0 = inlined_call_operand.hbm [shape: f32[8,32], index: 0, kind: input, shape index: {}]   ;;  %s759_s1 = inlined_call_operand.hbm [shape: bf16[32,128], index: 1, kind: input, shape index: {}]   ;;  %s760_s2 = inlined_call_operand.vmem [shape: f32[1,128], index: 2, kind: input, shape index: {}]   ;;  %s761_s3 = inlined_call_operand.vmem [shape: bf16[128,128], index: 3, kind: input, shape index: {}]   ;;  %s762_s4 = inlined_call_operand.vmem [shape: f32[1,128], index: 4, kind: input, shape index: {}]   ;;  %s763_s5 = inlined_call_operand.hbm [shape: bf16[128,128], index: 5, kind: input, shape index: {}]   ;;  %s764_s6 = inlined_call_operand.vmem [shape: f32[1,128], index: 6, kind: input, shape index: {}]   ;;  %s765_s7 = inlined_call_operand.vmem [shape: bf16[128,8], index: 7, kind: input, shape index: {}]   ;;  %s766_s8 = inlined_call_operand.vmem [shape: f32[1,8], index: 8, kind: input, shape index: {}]   ;;  %s767_s9 = inlined_call_operand.hbm [shape: f32[8,8], index: 9, kind: output, shape index: {}]  }
   0x1   :  { %15 = vsyncpa [#allocation6], 0  ;;  %s32_s11 = sshll.u32 %s759_s1, 4  ;;  %s33_s11 = int_to_ptr.hbm [resolvable:$true] %s32_s11 }
   0x2   :  { %16 = vsyncpa [#allocation4], 0  ;;  %s630_s12 = smov [#allocation5]   ;;  %s22_s16 = sshll.u32 %s758_s0, 4  ;;  %s23_s16 = int_to_ptr.hbm [resolvable:$true] %s22_s16 }
   0x3   :  { %s34_s13 = sshll.u32 %s630_s12, 4  ;;  %s631_s17 = smov 64   ;;  %s35_s13 = int_to_ptr.vmem [resolvable:$true] %s34_s13 }
   0x4   :  { %s632_s18 = smov 4   ;;  %s633_s19 = smov [#allocation2]  }
   0x5   :  { %40 = dma.hbm_to_vmem [thread:$0]  %s33_s11, 256, %s35_s13, [#allocation6], %s631_s17, %s631_s17, %s632_s18  }
   0x6   :  { %s24_s20 = sshll.u32 %s633_s19, 4  ;;  %s51_s23 = sshll.u32 %s763_s5, 4  ;;  %s25_s20 = int_to_ptr.vmem [resolvable:$true] %s24_s20  ;;  %s52_s23 = int_to_ptr.hbm [resolvable:$true] %s51_s23 }
   0x7   :  { %27 = dma.hbm_to_vmem [thread:$0]  %s23_s16, 128, %s25_s20, [#allocation3]  }
   0x8   :  { %s634_s1 = smov [#allocation7]  }
   0x9   :  { %s53_s24 = sshll.u32 %s634_s1, 4  ;;  %s54_s24 = int_to_ptr.vmem [resolvable:$true] %s53_s24 }
   0xa   :  { %59 = dma.hbm_to_vmem [thread:$0]  %s52_s23, 1024, %s54_s24, [#allocation6], %s631_s17, %s631_s17, %s632_s18  }
   0xb   :  { %624 = dma.done.wait [#allocation3], 128  }
   0xc   :  { %625 = vsyncadd [#allocation3], 4294967168 }
   0xd   :  { %626 = dma.done.wait [#allocation6], 1280  }
   0xe   :  { %627 = vsyncadd [#allocation6], 4294966016  ;;  %v493_v0 = vld [vmem:[#allocation5 + $0x8] sm:$0xff]  ;;  %v501_v1 = vld [vmem:[%s761_s3 + $0x38] sm:$0xff]  ;;  %vm101_vm0 = vcmask 261120   ;;  %s635_s15 = smov [#allocation8]  }
   0xf   :  { %111 = vmatpush.bf16.msra.mxu0 %v493_v0  ;;  %v492_v2 = vld [vmem:[#allocation5] sm:$0xff]  ;;  %v79_v3 = vld [vmem:[#allocation2] sm:$0xff]  ;;  %188 = vmatpush.bf16.msra.mxu1 %v501_v1  ;;  %v500_v4 = vld [vmem:[%s761_s3 + $0x30] sm:$0xff]  ;;  %s374_s16 = sshll.u32 %s635_s15, 4  ;;  %vm367_vm1 = vcmask 64512   ;;  %s375_s16 = int_to_ptr.vmem [resolvable:$true] %s374_s16 }
  0x10   :  { %v80_v5 = vpack.c.bf16 %v79_v3, %v79_v3  ;;  %v499_v6 = vld [vmem:[%s761_s3 + $0x28] sm:$0xff]  ;;  %v498_v7 = vld [vmem:[%s761_s3 + $0x20] sm:$0xff]  ;;  %v497_v8 = vld [vmem:[%s761_s3 + $0x18] sm:$0xff] }
  0x11   :  { %v496_v9 = vld [vmem:[%s761_s3 + $0x10] sm:$0xff]  ;;  %v495_v10 = vld [vmem:[%s761_s3 + $0x8] sm:$0xff]  ;;  %v494_v11 = vld [vmem:[%s761_s3] sm:$0xff] }
  0x12   :  { %v509_v12 = vld [vmem:[#allocation7 + $0x38] sm:$0xff]  ;;  %v508_v13 = vld [vmem:[#allocation7 + $0x30] sm:$0xff]  ;;  %v507_v14 = vld [vmem:[#allocation7 + $0x28] sm:$0xff] }
  0x13   :  { %112 = vmatpush.bf16.msra.mxu0 %v492_v2  ;;  %189 = vmatpush.bf16.msra.mxu1 %v500_v4  ;;  %v506_v15 = vld [vmem:[#allocation7 + $0x20] sm:$0xff]  ;;  %v505_v16 = vld [vmem:[#allocation7 + $0x18] sm:$0xff]  ;;  %v504_v17 = vld [vmem:[#allocation7 + $0x10] sm:$0xff] }
  0x14   :  { %271 = vmatpush.bf16.msra.mxu2 %v509_v12  ;;  %v524_v18 = vld [vmem:[%s760_s2] ss:$0 sm:$0xff]  ;;  %v502_v25 = vld [vmem:[#allocation7] sm:$0xff]  ;;  %v516_v27 = vld [vmem:[%s765_s7 + $0x30] sm:$0xff] }
  0x15   :  { %v503_v24 = vld [vmem:[#allocation7 + $0x8] sm:$0xff]  ;;  %v517_v26 = vld [vmem:[%s765_s7 + $0x38] sm:$0xff]  ;;  %v515_v28 = vld [vmem:[%s765_s7 + $0x28] sm:$0xff] }
  0x16   :  { %395 = vmatmul.msk.bf16.vlgmr.msra.gmra.mxu0 %vm101_vm0, %v80_v5  ;;  %354 = vmatpush.bf16.msra.mxu3 %v517_v26  ;;  %v514_v29 = vld [vmem:[%s765_s7 + $0x20] sm:$0xff]  ;;  %v513_v30 = vld [vmem:[%s765_s7 + $0x18] sm:$0xff]  ;;  %v512_v31 = vld [vmem:[%s765_s7 + $0x10] sm:$0xff] }
  0x17   :  { %190 = vmatpush.bf16.msra.mxu1 %v499_v6  ;;  %v525_v32 = vld [vmem:[%s762_s4] ss:$0 sm:$0xff]  ;;  %v511_v38 = vld [vmem:[%s765_s7 + $0x8] sm:$0xff] }
  0x18   :  { %272 = vmatpush.bf16.msra.mxu2 %v508_v13  ;;  %v510_v39 = vld [vmem:[%s765_s7] sm:$0xff]  ;;  %s376_s7 = sshll.u32 %s767_s9, 4  ;;  %s377_s7 = int_to_ptr.hbm [resolvable:$true] %s376_s7 }
  0x19   :  { %v526_v40 = vld [vmem:[%s764_s6] ss:$0 sm:$0xff] }
  0x1a   :  { %355 = vmatpush.bf16.msra.mxu3 %v516_v27  ;;  %v527_v46 = vld [vmem:[%s766_s8] ss:$0 sm:$0xff] }
  0x1b   :  { %191 = vmatpush.bf16.msra.mxu1 %v498_v7 }
  0x1c   :  { %273 = vmatpush.bf16.msra.mxu2 %v507_v14 }
  0x1e   :  { %356 = vmatpush.bf16.msra.mxu3 %v515_v28 }
  0x1f   :  { %192 = vmatpush.bf16.msra.mxu1 %v497_v8 }
  0x20   :  { %274 = vmatpush.bf16.msra.mxu2 %v506_v15 }
  0x22   :  { %357 = vmatpush.bf16.msra.mxu3 %v514_v29 }
  0x23   :  { %193 = vmatpush.bf16.msra.mxu1 %v496_v9 }
  0x24   :  { %275 = vmatpush.bf16.msra.mxu2 %v505_v16 }
  0x26   :  { %358 = vmatpush.bf16.msra.mxu3 %v513_v30 }
  0x27   :  { %194 = vmatpush.bf16.msra.mxu1 %v495_v10 }
  0x28   :  { %276 = vmatpush.bf16.msra.mxu2 %v504_v17 }
  0x2a   :  { %359 = vmatpush.bf16.msra.mxu3 %v512_v31 }
  0x2b   :  { %195 = vmatpush.bf16.msra.mxu1 %v494_v11 }
  0x2c   :  { %277 = vmatpush.bf16.msra.mxu2 %v503_v24 }
  0x2e   :  { %360 = vmatpush.bf16.msra.mxu3 %v511_v38 }
  0x30   :  { %278 = vmatpush.bf16.msra.mxu2 %v502_v25 }
  0x32   :  { %361 = vmatpush.bf16.msra.mxu3 %v510_v39 }
  0x93   :  { %v114_v19 = vpop.f32.mrf.mxu0 }
  0x94   :  { %v115_v20 = vadd.f32 %v524_v18, %v114_v19 }
  0x96   :  { %v118_v21 = vmax.f32 %v115_v20, 0.0 }
  0x98   :  { %v119_v22 = vpack.c.bf16 %v118_v21, %v118_v21 }
  0x9a   :  { %196 = vmatmul.bf16.vlgmr.msra.gmra.mxu1 %v119_v22 }
  0x9b   :  { %v116_v23 = vpop.f32.mrf.mxu0 }
 0x117   :  { %v197_v33 = vpop.f32.mrf.mxu1 }
 0x118   :  { %v198_v34 = vadd.f32 %v525_v32, %v197_v33 }
 0x11a   :  { %v201_v35 = vmax.f32 %v198_v34, 0.0 }
 0x11c   :  { %v202_v36 = vpack.c.bf16 %v201_v35, %v201_v35 }
 0x11e   :  { %279 = vmatmul.bf16.vlgmr.msra.gmra.mxu2 %v202_v36 }
 0x11f   :  { %v199_v37 = vpop.f32.mrf.mxu1 }
 0x1a1   :  { %v280_v41 = vpop.f32.mrf.mxu2 }
 0x1a2   :  { %v281_v42 = vadd.f32 %v526_v40, %v280_v41 }
 0x1a4   :  { %v284_v43 = vmax.f32 %v281_v42, 0.0 }
 0x1a6   :  { %v285_v44 = vpack.c.bf16 %v284_v43, %v284_v43 }
 0x1a8   :  { %362 = vmatmul.bf16.vlgmr.msra.gmra.mxu3 %v285_v44 }
 0x1a9   :  { %v282_v45 = vpop.f32.mrf.mxu2 }
 0x22b   :  { %v363_v47 = vpop.f32.mrf.mxu3 }
 0x22c   :  { %v364_v48 = vadd.f32 %v527_v46, %v363_v47 }
 0x22e   :  { %368 = vst.msk [vmem:[#allocation8] sm:$0xff] %vm367_vm1, %v364_v48 }
 0x22f   :  { %379 = dma.vmem_to_hbm [thread:$0]  %s375_s16, 128, %s377_s7, [#allocation4]  }
 0x233   :  { %v365_v49 = vpop.f32.mrf.mxu3 }
 0x234   :  { %628 = dma.done.wait [#allocation4], 128  }
 0x235   :  { %629 = vsyncadd [#allocation4], 4294967168 }
 0x236   :  { %384 = vsyncpa [#allocation3], 1 }
 0x237   :  { %385 = vsyncpa [#allocation6], 1 }
 0x238   :  { %386 = vsyncpa [#allocation4], 1 }

</bundles_post_ra>
